<compile_context>
chip_gen: v7x
topology: tpu7x:2x2x1
jax: 0.10.0
libtpu: 0.0.40
codegen_flags: <defaults>
</compile_context>

<pallas_src>
import jax
import jax.numpy as jnp
from jax import lax
from jax.experimental import pallas as pl
from jax.experimental.pallas import tpu as pltpu

EPS = 1e-5


def _pick_tile(P):
    """Largest lane-dense (multiple-of-128) pixel tile dividing P.

    Prefers >=2 grid steps so the parallel grid can shard across TensorCores
    (v7x).  Tiles are small per step (<=2048 lanes x channels, f32), well
    inside even v7x's 64 MiB VMEM with double buffering.
    """
    for tp in (2048, 1024, 512, 256, 128):
        if P % tp == 0 and P // tp >= 2:
            return tp
    for tp in (2048, 1024, 512, 256, 128):
        if P % tp == 0:
            return tp
    return P  # fallback: single full-extent block (always legal)


# ---------------------------------------------------------------------------
# Pass 1: per-channel statistics of the W_g / W_x conv outputs.
# The conv results live only in VMEM; just the tiny per-tile partial sums are
# written out (one block per grid step -> grid stays "parallel").
# ---------------------------------------------------------------------------
def _proj_stats_kernel(gt_ref, xt_ref, wg_ref, bg_ref, wx_ref, bx_ref,
                       sg_ref, qg_ref, sx_ref, qx_ref):
    # gt_ref/xt_ref : (F_g|F_l, TP) channel-major pixel tiles (lane-dense)
    # wg_ref/wx_ref : (F_int, F_g|F_l)   bg_ref/bx_ref: (F_int, 1)
    g1 = jnp.dot(wg_ref[...], gt_ref[...],
                 preferred_element_type=jnp.float32) + bg_ref[...]
    x1 = jnp.dot(wx_ref[...], xt_ref[...],
                 preferred_element_type=jnp.float32) + bx_ref[...]
    sg_ref[0] = jnp.sum(g1, axis=-1, keepdims=True)
    qg_ref[0] = jnp.sum(g1 * g1, axis=-1, keepdims=True)
    sx_ref[0] = jnp.sum(x1, axis=-1, keepdims=True)
    qx_ref[0] = jnp.sum(x1 * x1, axis=-1, keepdims=True)


def _proj_stats(gT, xT, wg, bg, wx, bx, TP):
    F_g, P = gT.shape
    F_l = xT.shape[0]
    F_int = wg.shape[0]
    nt = P // TP
    stat = jax.ShapeDtypeStruct((nt, F_int, 1), jnp.float32)
    return pl.pallas_call(
        _proj_stats_kernel,
        grid=(nt,),
        in_specs=[
            pl.BlockSpec((F_g, TP), lambda i: (0, i)),
            pl.BlockSpec((F_l, TP), lambda i: (0, i)),
            pl.BlockSpec((F_int, F_g), lambda i: (0, 0)),
            pl.BlockSpec((F_int, 1), lambda i: (0, 0)),
            pl.BlockSpec((F_int, F_l), lambda i: (0, 0)),
            pl.BlockSpec((F_int, 1), lambda i: (0, 0)),
        ],
        out_specs=(
            pl.BlockSpec((1, F_int, 1), lambda i: (i, 0, 0)),
            pl.BlockSpec((1, F_int, 1), lambda i: (i, 0, 0)),
            pl.BlockSpec((1, F_int, 1), lambda i: (i, 0, 0)),
            pl.BlockSpec((1, F_int, 1), lambda i: (i, 0, 0)),
        ),
        out_shape=(stat, stat, stat, stat),
        compiler_params=pltpu.CompilerParams(
            dimension_semantics=("parallel",)),
    )(gT, xT, wg, bg.reshape(F_int, 1), wx, bx.reshape(F_int, 1))


# ---------------------------------------------------------------------------
# Pass 2: recompute the two 1x1 convs with the BN affine folded into the
# weights, ReLU, psi 1x1 conv + its per-tile stats.
#   s       = ReLU(Wg' g + Wx' x + b')      (BN_g, BN_x folded into Wg', Wx', b')
#   psi_pre = wpsi @ s + bpsi
# ---------------------------------------------------------------------------
def _gate_proj_kernel(gt_ref, xt_ref, wg_ref, wx_ref, b_ref, wp_ref, bp_ref,
                      psi_ref, sp_ref, qp_ref):
    s = jnp.dot(wg_ref[...], gt_ref[...], preferred_element_type=jnp.float32)
    s = s + jnp.dot(wx_ref[...], xt_ref[...],
                    preferred_element_type=jnp.float32)
    s = jnp.maximum(s + b_ref[...], 0.0)
    p = jnp.dot(wp_ref[...], s, preferred_element_type=jnp.float32) + bp_ref[...]
    psi_ref[...] = p
    sp_ref[0] = jnp.sum(p, axis=-1, keepdims=True)
    qp_ref[0] = jnp.sum(p * p, axis=-1, keepdims=True)


def _gate_proj(gT, xT, wg_fold, wx_fold, b_fold, wpsi, bpsi, TP):
    F_g, P = gT.shape
    F_l = xT.shape[0]
    F_int = wg_fold.shape[0]
    nt = P // TP
    stat = jax.ShapeDtypeStruct((nt, 1, 1), jnp.float32)
    return pl.pallas_call(
        _gate_proj_kernel,
        grid=(nt,),
        in_specs=[
            pl.BlockSpec((F_g, TP), lambda i: (0, i)),
            pl.BlockSpec((F_l, TP), lambda i: (0, i)),
            pl.BlockSpec((F_int, F_g), lambda i: (0, 0)),
            pl.BlockSpec((F_int, F_l), lambda i: (0, 0)),
            pl.BlockSpec((F_int, 1), lambda i: (0, 0)),
            pl.BlockSpec((1, F_int), lambda i: (0, 0)),
            pl.BlockSpec((1, 1), lambda i: (0, 0)),
        ],
        out_specs=(
            pl.BlockSpec((1, TP), lambda i: (0, i)),
            pl.BlockSpec((1, 1, 1), lambda i: (i, 0, 0)),
            pl.BlockSpec((1, 1, 1), lambda i: (i, 0, 0)),
        ),
        out_shape=(
            jax.ShapeDtypeStruct((1, P), jnp.float32),
            stat, stat,
        ),
        compiler_params=pltpu.CompilerParams(
            dimension_semantics=("parallel",)),
    )(gT, xT, wg_fold, wx_fold, b_fold, wpsi, bpsi)


# ---------------------------------------------------------------------------
# Pass 3: BN(psi) + sigmoid fused with the elementwise gating of x
# ---------------------------------------------------------------------------
def _gate_apply_kernel(xt_ref, psi_ref, sc_ref, sh_ref, out_ref):
    z = psi_ref[...] * sc_ref[...] + sh_ref[...]
    gate = jax.nn.sigmoid(z)               # exp/recip run on the EUP slot
    out_ref[...] = xt_ref[...] * gate


def _gate_apply(xT, psi_pre, scale, shift, TP):
    F_l, P = xT.shape
    nt = P // TP
    return pl.pallas_call(
        _gate_apply_kernel,
        grid=(nt,),
        in_specs=[
            pl.BlockSpec((F_l, TP), lambda i: (0, i)),
            pl.BlockSpec((1, TP), lambda i: (0, i)),
            pl.BlockSpec((1, 1), lambda i: (0, 0)),
            pl.BlockSpec((1, 1), lambda i: (0, 0)),
        ],
        out_specs=pl.BlockSpec((F_l, TP), lambda i: (0, i)),
        out_shape=jax.ShapeDtypeStruct((F_l, P), jnp.float32),
        compiler_params=pltpu.CompilerParams(
            dimension_semantics=("parallel",)),
    )(xT, psi_pre, scale, shift)


# ---------------------------------------------------------------------------
# Host-side per-channel math (tiny): fold BN(mean, var, gamma, beta) -> affine
# ---------------------------------------------------------------------------
def _fold_bn(psum, psq, count, gamma, beta):
    mean = psum / count
    # clamp guards against tiny negative values from E[x^2]-E[x]^2 cancellation
    var = jnp.maximum(psq / count - mean * mean, 0.0)
    scale = gamma * lax.rsqrt(var + EPS)
    shift = beta - mean * scale
    return scale, shift


@jax.jit
def attention_block_forward(g, x, params):
    N, F_g, H, W = g.shape
    F_l = x.shape[1]
    F_int = params["wg"].shape[0]
    P = N * H * W
    TP = _pick_tile(P)

    # PyTorch NCHW -> channel-major (C, N*H*W): pixels on the lane axis.
    gT = jnp.transpose(g, (1, 0, 2, 3)).reshape(F_g, P)
    xT = jnp.transpose(x, (1, 0, 2, 3)).reshape(F_l, P)

    # Pass 1: per-channel statistics of the g / x projections (no big writes).
    sg, qg, sx, qx = _proj_stats(
        gT, xT, params["wg"], params["bg"], params["wx"], params["bx"], TP)

    count = jnp.float32(P)
    ag, cg = _fold_bn(jnp.sum(sg, axis=0)[:, 0], jnp.sum(qg, axis=0)[:, 0],
                      count, params["gamma_g"], params["beta_g"])
    ax, cx = _fold_bn(jnp.sum(sx, axis=0)[:, 0], jnp.sum(qx, axis=0)[:, 0],
                      count, params["gamma_x"], params["beta_x"])

    # Fold the BN affines straight into the 1x1 conv weights/bias (F_int-sized
    # host math), so pass 2 is matmul + ReLU + matmul with zero extra VALU work.
    wg_fold = ag[:, None] * params["wg"]
    wx_fold = ax[:, None] * params["wx"]
    b_fold = (ag * params["bg"] + cg + ax * params["bx"] + cx).reshape(F_int, 1)

    # Pass 2: recomputed convs + ReLU + psi conv with fused stats.
    # NOTE: recompute beats materializing g1/x1 whenever 4*F_int > F_g + F_l
    # (true for attention gates); it avoids 4*F_int*P floats of HBM traffic.
    psi_pre, sp, qp = _gate_proj(
        gT, xT, wg_fold, wx_fold, b_fold,
        params["wpsi"].reshape(1, F_int), params["bpsi"].reshape(1, 1), TP)

    ap, cp = _fold_bn(jnp.sum(sp, axis=0)[:, 0], jnp.sum(qp, axis=0)[:, 0],
                      count, params["gamma_psi"], params["beta_psi"])

    # Pass 3: BN + sigmoid + gate.
    outT = _gate_apply(xT, psi_pre, ap.reshape(1, 1), cp.reshape(1, 1), TP)

    return jnp.transpose(outT.reshape(F_l, N, H, W), (1, 0, 2, 3))


def init_params(key, F_g, F_l, F_int):
    ks = jax.random.split(key, 6)
    return {
        # 1x1 conv weights stored as (Cout, Cin) == PyTorch OIHW weight squeezed
        "wg": 0.2 * jax.random.normal(ks[0], (F_int, F_g), jnp.float32),
        "bg": 0.1 * jax.random.normal(ks[1], (F_int,), jnp.float32),
        "wx": 0.2 * jax.random.normal(ks[2], (F_int, F_l), jnp.float32),
        "bx": 0.1 * jax.random.normal(ks[3], (F_int,), jnp.float32),
        "wpsi": 0.2 * jax.random.normal(ks[4], (1, F_int), jnp.float32),
        "bpsi": 0.1 * jax.random.normal(ks[5], (1,), jnp.float32),
        # Fresh nn.BatchNorm2d: weight=1, bias=0
        "gamma_g": jnp.ones((F_int,), jnp.float32),
        "beta_g": jnp.zeros((F_int,), jnp.float32),
        "gamma_x": jnp.ones((F_int,), jnp.float32),
        "beta_x": jnp.zeros((F_int,), jnp.float32),
        "gamma_psi": jnp.ones((1,), jnp.float32),
        "beta_psi": jnp.zeros((1,), jnp.float32),
    }


def _reference_forward(g, x, p):
    """Pure-JAX reference mirroring the PyTorch module (train-mode BN)."""
    def conv1x1(y, w, b):
        return jnp.einsum("nchw,oc->nohw", y, w) + b[None, :, None, None]

    def bn(y, gamma, beta):
        m = jnp.mean(y, axis=(0, 2, 3))
        v = jnp.mean(jnp.square(y - m[None, :, None, None]), axis=(0, 2, 3))
        z = (y - m[None, :, None, None]) * lax.rsqrt(v + EPS)[None, :, None, None]
        return z * gamma[None, :, None, None] + beta[None, :, None, None]

    g1 = bn(conv1x1(g, p["wg"], p["bg"]), p["gamma_g"], p["beta_g"])
    x1 = bn(conv1x1(x, p["wx"], p["bx"]), p["gamma_x"], p["beta_x"])
    s = jnp.maximum(g1 + x1, 0.0)
    psi = bn(conv1x1(s, p["wpsi"], p["bpsi"]), p["gamma_psi"], p["beta_psi"])
    psi = jax.nn.sigmoid(psi)
    return x * psi


if __name__ == "__main__":
    key = jax.random.PRNGKey(0)
    kg, kx, kp = jax.random.split(key, 3)

    N, F_g, F_l, F_int, H, W = 2, 4, 4, 32, 16, 16
    g = jax.random.normal(kg, (N, F_g, H, W), jnp.float32)
    x = jax.random.normal(kx, (N, F_l, H, W), jnp.float32)
    params = init_params(kp, F_g, F_l, F_int)

    out = jax.block_until_ready(attention_block_forward(g, x, params))
    assert out.shape == (N, F_l, H, W), out.shape

    ref = jax.block_until_ready(_reference_forward(g, x, params))
    err = float(jnp.max(jnp.abs(out - ref)))
    assert err < 2e-3, f"mismatch vs reference: {err}"

    print("KERNEL_OK")
</pallas_src>

<mosaic_0001>
module attributes {stable_mosaic.version = 11 : i64} {
  func.func @_proj_stats_kernel(%arg0: i32, %arg1: memref<4x256xf32, #tpu.memory_space<vmem>>, %arg2: memref<4x256xf32, #tpu.memory_space<vmem>>, %arg3: memref<32x4xf32, #tpu.memory_space<vmem>>, %arg4: memref<32x1xf32, #tpu.memory_space<vmem>>, %arg5: memref<32x4xf32, #tpu.memory_space<vmem>>, %arg6: memref<32x1xf32, #tpu.memory_space<vmem>>, %arg7: memref<1x32x1xf32, #tpu.memory_space<vmem>>, %arg8: memref<1x32x1xf32, #tpu.memory_space<vmem>>, %arg9: memref<1x32x1xf32, #tpu.memory_space<vmem>>, %arg10: memref<1x32x1xf32, #tpu.memory_space<vmem>>) attributes {dimension_semantics = [#tpu.dimension_semantics<parallel>], iteration_bounds = array<i64: 2>, scalar_prefetch = 0 : i64, scratch_operands = 0 : i64, tpu.core_type = #tpu.core_type<tc>, window_params = [{transform_indices = @transform_0, window_bounds = array<i64: 4, 256>}, {transform_indices = @transform_1, window_bounds = array<i64: 4, 256>}, {pipeline_mode = #tpu.pipeline_mode<synchronous>, transform_indices = @transform_2, window_bounds = array<i64: 32, 4>}, {pipeline_mode = #tpu.pipeline_mode<synchronous>, transform_indices = @transform_3, window_bounds = array<i64: 32, 1>}, {pipeline_mode = #tpu.pipeline_mode<synchronous>, transform_indices = @transform_4, window_bounds = array<i64: 32, 4>}, {pipeline_mode = #tpu.pipeline_mode<synchronous>, transform_indices = @transform_5, window_bounds = array<i64: 32, 1>}, {transform_indices = @transform_6, window_bounds = array<i64: 1, 32, 1>}, {transform_indices = @transform_7, window_bounds = array<i64: 1, 32, 1>}, {transform_indices = @transform_8, window_bounds = array<i64: 1, 32, 1>}, {transform_indices = @transform_9, window_bounds = array<i64: 1, 32, 1>}]} {
    %c0 = arith.constant 0 : index
    %c0_0 = arith.constant 0 : index
    %0 = vector.load %arg3[%c0, %c0_0] : memref<32x4xf32, #tpu.memory_space<vmem>>, vector<32x4xf32>
    %c0_1 = arith.constant 0 : index
    %c0_2 = arith.constant 0 : index
    %1 = vector.load %arg1[%c0_1, %c0_2] : memref<4x256xf32, #tpu.memory_space<vmem>>, vector<4x256xf32>
    %cst = arith.constant dense<0.000000e+00> : vector<32x256xf32>
    %2 = tpu.matmul %0, %1, %cst {dimension_numbers = #tpu.dot_dimension_numbers<[1], [0], [0], [1], [0, 0, 1, 1], [], []>} : vector<32x4xf32>, vector<4x256xf32>, vector<32x256xf32> -> vector<32x256xf32>
    %c0_3 = arith.constant 0 : index
    %c0_4 = arith.constant 0 : index
    %3 = vector.load %arg4[%c0_3, %c0_4] : memref<32x1xf32, #tpu.memory_space<vmem>>, vector<32x1xf32>
    %4 = vector.broadcast %3 : vector<32x1xf32> to vector<32x256xf32>
    %5 = arith.addf %2, %4 : vector<32x256xf32>
    %c0_5 = arith.constant 0 : index
    %c0_6 = arith.constant 0 : index
    %6 = vector.load %arg5[%c0_5, %c0_6] : memref<32x4xf32, #tpu.memory_space<vmem>>, vector<32x4xf32>
    %c0_7 = arith.constant 0 : index
    %c0_8 = arith.constant 0 : index
    %7 = vector.load %arg2[%c0_7, %c0_8] : memref<4x256xf32, #tpu.memory_space<vmem>>, vector<4x256xf32>
    %cst_9 = arith.constant dense<0.000000e+00> : vector<32x256xf32>
    %8 = tpu.matmul %6, %7, %cst_9 {dimension_numbers = #tpu.dot_dimension_numbers<[1], [0], [0], [1], [0, 0, 1, 1], [], []>} : vector<32x4xf32>, vector<4x256xf32>, vector<32x256xf32> -> vector<32x256xf32>
    %c0_10 = arith.constant 0 : index
    %c0_11 = arith.constant 0 : index
    %9 = vector.load %arg6[%c0_10, %c0_11] : memref<32x1xf32, #tpu.memory_space<vmem>>, vector<32x1xf32>
    %10 = vector.broadcast %9 : vector<32x1xf32> to vector<32x256xf32>
    %11 = arith.addf %8, %10 : vector<32x256xf32>
    %cst_12 = arith.constant dense<0.000000e+00> : vector<32xf32>
    %12 = vector.multi_reduction <add>, %5, %cst_12 [1] : vector<32x256xf32> to vector<32xf32>
    %13 = vector.shape_cast %12 : vector<32xf32> to vector<32x1xf32>
    %c0_13 = arith.constant 0 : index
    %c0_14 = arith.constant 0 : index
    %c0_15 = arith.constant 0 : index
    %14 = vector.load %arg7[%c0_13, %c0_14, %c0_15] : memref<1x32x1xf32, #tpu.memory_space<vmem>>, vector<1x32x1xf32>
    %15 = vector.shape_cast %14 : vector<1x32x1xf32> to vector<32x1xf32>
    %16 = vector.shape_cast %13 : vector<32x1xf32> to vector<1x32x1xf32>
    tpu.vector_store %arg7[%c0_13, %c0_14, %c0_15], %16 {strides = array<i32>} : memref<1x32x1xf32, #tpu.memory_space<vmem>>, vector<1x32x1xf32>,
    %17 = arith.mulf %5, %5 : vector<32x256xf32>
    %cst_16 = arith.constant dense<0.000000e+00> : vector<32xf32>
    %18 = vector.multi_reduction <add>, %17, %cst_16 [1] : vector<32x256xf32> to vector<32xf32>
    %19 = vector.shape_cast %18 : vector<32xf32> to vector<32x1xf32>
    %c0_17 = arith.constant 0 : index
    %c0_18 = arith.constant 0 : index
    %c0_19 = arith.constant 0 : index
    %20 = vector.load %arg8[%c0_17, %c0_18, %c0_19] : memref<1x32x1xf32, #tpu.memory_space<vmem>>, vector<1x32x1xf32>
    %21 = vector.shape_cast %20 : vector<1x32x1xf32> to vector<32x1xf32>
    %22 = vector.shape_cast %19 : vector<32x1xf32> to vector<1x32x1xf32>
    tpu.vector_store %arg8[%c0_17, %c0_18, %c0_19], %22 {strides = array<i32>} : memref<1x32x1xf32, #tpu.memory_space<vmem>>, vector<1x32x1xf32>,
    %cst_20 = arith.constant dense<0.000000e+00> : vector<32xf32>
    %23 = vector.multi_reduction <add>, %11, %cst_20 [1] : vector<32x256xf32> to vector<32xf32>
    %24 = vector.shape_cast %23 : vector<32xf32> to vector<32x1xf32>
    %c0_21 = arith.constant 0 : index
    %c0_22 = arith.constant 0 : index
    %c0_23 = arith.constant 0 : index
    %25 = vector.load %arg9[%c0_21, %c0_22, %c0_23] : memref<1x32x1xf32, #tpu.memory_space<vmem>>, vector<1x32x1xf32>
    %26 = vector.shape_cast %25 : vector<1x32x1xf32> to vector<32x1xf32>
    %27 = vector.shape_cast %24 : vector<32x1xf32> to vector<1x32x1xf32>
    tpu.vector_store %arg9[%c0_21, %c0_22, %c0_23], %27 {strides = array<i32>} : memref<1x32x1xf32, #tpu.memory_space<vmem>>, vector<1x32x1xf32>,
    %28 = arith.mulf %11, %11 : vector<32x256xf32>
    %cst_24 = arith.constant dense<0.000000e+00> : vector<32xf32>
    %29 = vector.multi_reduction <add>, %28, %cst_24 [1] : vector<32x256xf32> to vector<32xf32>
    %30 = vector.shape_cast %29 : vector<32xf32> to vector<32x1xf32>
    %c0_25 = arith.constant 0 : index
    %c0_26 = arith.constant 0 : index
    %c0_27 = arith.constant 0 : index
    %31 = vector.load %arg10[%c0_25, %c0_26, %c0_27] : memref<1x32x1xf32, #tpu.memory_space<vmem>>, vector<1x32x1xf32>
    %32 = vector.shape_cast %31 : vector<1x32x1xf32> to vector<32x1xf32>
    %33 = vector.shape_cast %30 : vector<32x1xf32> to vector<1x32x1xf32>
    tpu.vector_store %arg10[%c0_25, %c0_26, %c0_27], %33 {strides = array<i32>} : memref<1x32x1xf32, #tpu.memory_space<vmem>>, vector<1x32x1xf32>,
    return
  }
  func.func @transform_0(%arg0: i32) -> (i32, i32) {
    %c0_i32 = arith.constant 0 : i32
    %c0_i32_0 = arith.constant 0 : i32
    return %c0_i32, %arg0 : i32, i32
  }
  func.func @transform_1(%arg0: i32) -> (i32, i32) {
    %c0_i32 = arith.constant 0 : i32
    %c0_i32_0 = arith.constant 0 : i32
    return %c0_i32, %arg0 : i32, i32
  }
  func.func @transform_2(%arg0: i32) -> (i32, i32) {
    %c0_i32 = arith.constant 0 : i32
    %c0_i32_0 = arith.constant 0 : i32
    %c0_i32_1 = arith.constant 0 : i32
    return %c0_i32, %c0_i32_0 : i32, i32
  }
  func.func @transform_3(%arg0: i32) -> (i32, i32) {
    %c0_i32 = arith.constant 0 : i32
    %c0_i32_0 = arith.constant 0 : i32
    %c0_i32_1 = arith.constant 0 : i32
    return %c0_i32, %c0_i32_0 : i32, i32
  }
  func.func @transform_4(%arg0: i32) -> (i32, i32) {
    %c0_i32 = arith.constant 0 : i32
    %c0_i32_0 = arith.constant 0 : i32
    %c0_i32_1 = arith.constant 0 : i32
    return %c0_i32, %c0_i32_0 : i32, i32
  }
  func.func @transform_5(%arg0: i32) -> (i32, i32) {
    %c0_i32 = arith.constant 0 : i32
    %c0_i32_0 = arith.constant 0 : i32
    %c0_i32_1 = arith.constant 0 : i32
    return %c0_i32, %c0_i32_0 : i32, i32
  }
  func.func @transform_6(%arg0: i32) -> (i32, i32, i32) {
    %c0_i32 = arith.constant 0 : i32
    %c0_i32_0 = arith.constant 0 : i32
    %c0_i32_1 = arith.constant 0 : i32
    return %arg0, %c0_i32, %c0_i32_0 : i32, i32, i32
  }
  func.func @transform_7(%arg0: i32) -> (i32, i32, i32) {
    %c0_i32 = arith.constant 0 : i32
    %c0_i32_0 = arith.constant 0 : i32
    %c0_i32_1 = arith.constant 0 : i32
    return %arg0, %c0_i32, %c0_i32_0 : i32, i32, i32
  }
  func.func @transform_8(%arg0: i32) -> (i32, i32, i32) {
    %c0_i32 = arith.constant 0 : i32
    %c0_i32_0 = arith.constant 0 : i32
    %c0_i32_1 = arith.constant 0 : i32
    return %arg0, %c0_i32, %c0_i32_0 : i32, i32, i32
  }
  func.func @transform_9(%arg0: i32) -> (i32, i32, i32) {
    %c0_i32 = arith.constant 0 : i32
    %c0_i32_0 = arith.constant 0 : i32
    %c0_i32_1 = arith.constant 0 : i32
    return %arg0, %c0_i32, %c0_i32_0 : i32, i32, i32
  }
}

module attributes {stable_mosaic.version = 11 : i64} {
  func.func @_gate_apply_kernel(%arg0: i32, %arg1: memref<4x256xf32, #tpu.memory_space<vmem>>, %arg2: memref<1x256xf32, #tpu.memory_space<vmem>>, %arg3: memref<1x1xf32, #tpu.memory_space<vmem>>, %arg4: memref<1x1xf32, #tpu.memory_space<vmem>>, %arg5: memref<4x256xf32, #tpu.memory_space<vmem>>) attributes {dimension_semantics = [#tpu.dimension_semantics<parallel>], iteration_bounds = array<i64: 2>, scalar_prefetch = 0 : i64, scratch_operands = 0 : i64, tpu.core_type = #tpu.core_type<tc>, window_params = [{transform_indices = @transform_0, window_bounds = array<i64: 4, 256>}, {transform_indices = @transform_1, window_bounds = array<i64: 1, 256>}, {pipeline_mode = #tpu.pipeline_mode<synchronous>, transform_indices = @transform_2, window_bounds = array<i64: 1, 1>}, {pipeline_mode = #tpu.pipeline_mode<synchronous>, transform_indices = @transform_3, window_bounds = array<i64: 1, 1>}, {transform_indices = @transform_4, window_bounds = array<i64: 4, 256>}]} {
    %c0 = arith.constant 0 : index
    %c0_0 = arith.constant 0 : index
    %0 = vector.load %arg2[%c0, %c0_0] : memref<1x256xf32, #tpu.memory_space<vmem>>, vector<1x256xf32>
    %c0_1 = arith.constant 0 : index
    %c0_2 = arith.constant 0 : index
    %1 = vector.load %arg3[%c0_1, %c0_2] : memref<1x1xf32, #tpu.memory_space<vmem>>, vector<1x1xf32>
    %2 = vector.broadcast %1 : vector<1x1xf32> to vector<1x256xf32>
    %3 = arith.mulf %0, %2 : vector<1x256xf32>
    %c0_3 = arith.constant 0 : index
    %c0_4 = arith.constant 0 : index
    %4 = vector.load %arg4[%c0_3, %c0_4] : memref<1x1xf32, #tpu.memory_space<vmem>>, vector<1x1xf32>
    %5 = vector.broadcast %4 : vector<1x1xf32> to vector<1x256xf32>
    %6 = arith.addf %3, %5 : vector<1x256xf32>
    %7 = arith.negf %6 : vector<1x256xf32>
    %8 = math.exp %7 : vector<1x256xf32>
    %cst = arith.constant 1.000000e+00 : f32
    %9 = vector.broadcast %cst : f32 to vector<1x256xf32>
    %10 = arith.addf %9, %8 : vector<1x256xf32>
    %11 = arith.divf %9, %10 : vector<1x256xf32>
    %c0_5 = arith.constant 0 : index
    %c0_6 = arith.constant 0 : index
    %12 = vector.load %arg1[%c0_5, %c0_6] : memref<4x256xf32, #tpu.memory_space<vmem>>, vector<4x256xf32>
    %13 = vector.broadcast %11 : vector<1x256xf32> to vector<4x256xf32>
    %14 = arith.mulf %12, %13 : vector<4x256xf32>
    %c0_7 = arith.constant 0 : index
    %c0_8 = arith.constant 0 : index
    %15 = vector.load %arg5[%c0_7, %c0_8] : memref<4x256xf32, #tpu.memory_space<vmem>>, vector<4x256xf32>
    tpu.vector_store %arg5[%c0_7, %c0_8], %14 {strides = array<i32>} : memref<4x256xf32, #tpu.memory_space<vmem>>, vector<4x256xf32>,
    return
  }
  func.func @transform_0(%arg0: i32) -> (i32, i32) {
    %c0_i32 = arith.constant 0 : i32
    %c0_i32_0 = arith.constant 0 : i32
    return %c0_i32, %arg0 : i32, i32
  }
  func.func @transform_1(%arg0: i32) -> (i32, i32) {
    %c0_i32 = arith.constant 0 : i32
    %c0_i32_0 = arith.constant 0 : i32
    return %c0_i32, %arg0 : i32, i32
  }
  func.func @transform_2(%arg0: i32) -> (i32, i32) {
    %c0_i32 = arith.constant 0 : i32
    %c0_i32_0 = arith.constant 0 : i32
    %c0_i32_1 = arith.constant 0 : i32
    return %c0_i32, %c0_i32_0 : i32, i32
  }
  func.func @transform_3(%arg0: i32) -> (i32, i32) {
    %c0_i32 = arith.constant 0 : i32
    %c0_i32_0 = arith.constant 0 : i32
    %c0_i32_1 = arith.constant 0 : i32
    return %c0_i32, %c0_i32_0 : i32, i32
  }
  func.func @transform_4(%arg0: i32) -> (i32, i32) {
    %c0_i32 = arith.constant 0 : i32
    %c0_i32_0 = arith.constant 0 : i32
    return %c0_i32, %arg0 : i32, i32
  }
}

module attributes {stable_mosaic.version = 11 : i64} {
  func.func @_gate_proj_kernel(%arg0: i32, %arg1: memref<4x256xf32, #tpu.memory_space<vmem>>, %arg2: memref<4x256xf32, #tpu.memory_space<vmem>>, %arg3: memref<32x4xf32, #tpu.memory_space<vmem>>, %arg4: memref<32x4xf32, #tpu.memory_space<vmem>>, %arg5: memref<32x1xf32, #tpu.memory_space<vmem>>, %arg6: memref<1x32xf32, #tpu.memory_space<vmem>>, %arg7: memref<1x1xf32, #tpu.memory_space<vmem>>, %arg8: memref<1x256xf32, #tpu.memory_space<vmem>>, %arg9: memref<1x1x1xf32, #tpu.memory_space<vmem>>, %arg10: memref<1x1x1xf32, #tpu.memory_space<vmem>>) attributes {dimension_semantics = [#tpu.dimension_semantics<parallel>], iteration_bounds = array<i64: 2>, scalar_prefetch = 0 : i64, scratch_operands = 0 : i64, tpu.core_type = #tpu.core_type<tc>, window_params = [{transform_indices = @transform_0, window_bounds = array<i64: 4, 256>}, {transform_indices = @transform_1, window_bounds = array<i64: 4, 256>}, {pipeline_mode = #tpu.pipeline_mode<synchronous>, transform_indices = @transform_2, window_bounds = array<i64: 32, 4>}, {pipeline_mode = #tpu.pipeline_mode<synchronous>, transform_indices = @transform_3, window_bounds = array<i64: 32, 4>}, {pipeline_mode = #tpu.pipeline_mode<synchronous>, transform_indices = @transform_4, window_bounds = array<i64: 32, 1>}, {pipeline_mode = #tpu.pipeline_mode<synchronous>, transform_indices = @transform_5, window_bounds = array<i64: 1, 32>}, {pipeline_mode = #tpu.pipeline_mode<synchronous>, transform_indices = @transform_6, window_bounds = array<i64: 1, 1>}, {transform_indices = @transform_7, window_bounds = array<i64: 1, 256>}, {transform_indices = @transform_8, window_bounds = array<i64: 1, 1, 1>}, {transform_indices = @transform_9, window_bounds = array<i64: 1, 1, 1>}]} {
    %c0 = arith.constant 0 : index
    %c0_0 = arith.constant 0 : index
    %0 = vector.load %arg3[%c0, %c0_0] : memref<32x4xf32, #tpu.memory_space<vmem>>, vector<32x4xf32>
    %c0_1 = arith.constant 0 : index
    %c0_2 = arith.constant 0 : index
    %1 = vector.load %arg1[%c0_1, %c0_2] : memref<4x256xf32, #tpu.memory_space<vmem>>, vector<4x256xf32>
    %cst = arith.constant dense<0.000000e+00> : vector<32x256xf32>
    %2 = tpu.matmul %0, %1, %cst {dimension_numbers = #tpu.dot_dimension_numbers<[1], [0], [0], [1], [0, 0, 1, 1], [], []>} : vector<32x4xf32>, vector<4x256xf32>, vector<32x256xf32> -> vector<32x256xf32>
    %c0_3 = arith.constant 0 : index
    %c0_4 = arith.constant 0 : index
    %3 = vector.load %arg4[%c0_3, %c0_4] : memref<32x4xf32, #tpu.memory_space<vmem>>, vector<32x4xf32>
    %c0_5 = arith.constant 0 : index
    %c0_6 = arith.constant 0 : index
    %4 = vector.load %arg2[%c0_5, %c0_6] : memref<4x256xf32, #tpu.memory_space<vmem>>, vector<4x256xf32>
    %cst_7 = arith.constant dense<0.000000e+00> : vector<32x256xf32>
    %5 = tpu.matmul %3, %4, %cst_7 {dimension_numbers = #tpu.dot_dimension_numbers<[1], [0], [0], [1], [0, 0, 1, 1], [], []>} : vector<32x4xf32>, vector<4x256xf32>, vector<32x256xf32> -> vector<32x256xf32>
    %6 = arith.addf %2, %5 : vector<32x256xf32>
    %c0_8 = arith.constant 0 : index
    %c0_9 = arith.constant 0 : index
    %7 = vector.load %arg5[%c0_8, %c0_9] : memref<32x1xf32, #tpu.memory_space<vmem>>, vector<32x1xf32>
    %8 = vector.broadcast %7 : vector<32x1xf32> to vector<32x256xf32>
    %9 = arith.addf %6, %8 : vector<32x256xf32>
    %cst_10 = arith.constant 0.000000e+00 : f32
    %10 = vector.broadcast %cst_10 : f32 to vector<32x256xf32>
    %11 = arith.maximumf %9, %10 : vector<32x256xf32>
    %c0_11 = arith.constant 0 : index
    %c0_12 = arith.constant 0 : index
    %12 = vector.load %arg6[%c0_11, %c0_12] : memref<1x32xf32, #tpu.memory_space<vmem>>, vector<1x32xf32>
    %cst_13 = arith.constant dense<0.000000e+00> : vector<1x256xf32>
    %13 = tpu.matmul %12, %11, %cst_13 {dimension_numbers = #tpu.dot_dimension_numbers<[1], [0], [0], [1], [0, 0, 1, 1], [], []>} : vector<1x32xf32>, vector<32x256xf32>, vector<1x256xf32> -> vector<1x256xf32>
    %c0_14 = arith.constant 0 : index
    %c0_15 = arith.constant 0 : index
    %14 = vector.load %arg7[%c0_14, %c0_15] : memref<1x1xf32, #tpu.memory_space<vmem>>, vector<1x1xf32>
    %15 = vector.broadcast %14 : vector<1x1xf32> to vector<1x256xf32>
    %16 = arith.addf %13, %15 : vector<1x256xf32>
    %c0_16 = arith.constant 0 : index
    %c0_17 = arith.constant 0 : index
    %17 = vector.load %arg8[%c0_16, %c0_17] : memref<1x256xf32, #tpu.memory_space<vmem>>, vector<1x256xf32>
    tpu.vector_store %arg8[%c0_16, %c0_17], %16 {strides = array<i32>} : memref<1x256xf32, #tpu.memory_space<vmem>>, vector<1x256xf32>,
    %cst_18 = arith.constant dense<0.000000e+00> : vector<1xf32>
    %18 = vector.multi_reduction <add>, %16, %cst_18 [1] : vector<1x256xf32> to vector<1xf32>
    %19 = vector.shape_cast %18 : vector<1xf32> to vector<1x1xf32>
    %c0_19 = arith.constant 0 : index
    %c0_20 = arith.constant 0 : index
    %c0_21 = arith.constant 0 : index
    %20 = vector.load %arg9[%c0_19, %c0_20, %c0_21] : memref<1x1x1xf32, #tpu.memory_space<vmem>>, vector<1x1x1xf32>
    %21 = vector.shape_cast %20 : vector<1x1x1xf32> to vector<1x1xf32>
    %22 = vector.shape_cast %19 : vector<1x1xf32> to vector<1x1x1xf32>
    tpu.vector_store %arg9[%c0_19, %c0_20, %c0_21], %22 {strides = array<i32>} : memref<1x1x1xf32, #tpu.memory_space<vmem>>, vector<1x1x1xf32>,
    %23 = arith.mulf %16, %16 : vector<1x256xf32>
    %cst_22 = arith.constant dense<0.000000e+00> : vector<1xf32>
    %24 = vector.multi_reduction <add>, %23, %cst_22 [1] : vector<1x256xf32> to vector<1xf32>
    %25 = vector.shape_cast %24 : vector<1xf32> to vector<1x1xf32>
    %c0_23 = arith.constant 0 : index
    %c0_24 = arith.constant 0 : index
    %c0_25 = arith.constant 0 : index
    %26 = vector.load %arg10[%c0_23, %c0_24, %c0_25] : memref<1x1x1xf32, #tpu.memory_space<vmem>>, vector<1x1x1xf32>
    %27 = vector.shape_cast %26 : vector<1x1x1xf32> to vector<1x1xf32>
    %28 = vector.shape_cast %25 : vector<1x1xf32> to vector<1x1x1xf32>
    tpu.vector_store %arg10[%c0_23, %c0_24, %c0_25], %28 {strides = array<i32>} : memref<1x1x1xf32, #tpu.memory_space<vmem>>, vector<1x1x1xf32>,
    return
  }
  func.func @transform_0(%arg0: i32) -> (i32, i32) {
    %c0_i32 = arith.constant 0 : i32
    %c0_i32_0 = arith.constant 0 : i32
    return %c0_i32, %arg0 : i32, i32
  }
  func.func @transform_1(%arg0: i32) -> (i32, i32) {
    %c0_i32 = arith.constant 0 : i32
    %c0_i32_0 = arith.constant 0 : i32
    return %c0_i32, %arg0 : i32, i32
  }
  func.func @transform_2(%arg0: i32) -> (i32, i32) {
    %c0_i32 = arith.constant 0 : i32
    %c0_i32_0 = arith.constant 0 : i32
    %c0_i32_1 = arith.constant 0 : i32
    return %c0_i32, %c0_i32_0 : i32, i32
  }
  func.func @transform_3(%arg0: i32) -> (i32, i32) {
    %c0_i32 = arith.constant 0 : i32
    %c0_i32_0 = arith.constant 0 : i32
    %c0_i32_1 = arith.constant 0 : i32
    return %c0_i32, %c0_i32_0 : i32, i32
  }
  func.func @transform_4(%arg0: i32) -> (i32, i32) {
    %c0_i32 = arith.constant 0 : i32
    %c0_i32_0 = arith.constant 0 : i32
    %c0_i32_1 = arith.constant 0 : i32
    return %c0_i32, %c0_i32_0 : i32, i32
  }
  func.func @transform_5(%arg0: i32) -> (i32, i32) {
    %c0_i32 = arith.constant 0 : i32
    %c0_i32_0 = arith.constant 0 : i32
    %c0_i32_1 = arith.constant 0 : i32
    return %c0_i32, %c0_i32_0 : i32, i32
  }
  func.func @transform_6(%arg0: i32) -> (i32, i32) {
    %c0_i32 = arith.constant 0 : i32
    %c0_i32_0 = arith.constant 0 : i32
    %c0_i32_1 = arith.constant 0 : i32
    return %c0_i32, %c0_i32_0 : i32, i32
  }
  func.func @transform_7(%arg0: i32) -> (i32, i32) {
    %c0_i32 = arith.constant 0 : i32
    %c0_i32_0 = arith.constant 0 : i32
    return %c0_i32, %arg0 : i32, i32
  }
  func.func @transform_8(%arg0: i32) -> (i32, i32, i32) {
    %c0_i32 = arith.constant 0 : i32
    %c0_i32_0 = arith.constant 0 : i32
    %c0_i32_1 = arith.constant 0 : i32
    return %arg0, %c0_i32, %c0_i32_0 : i32, i32, i32
  }
  func.func @transform_9(%arg0: i32) -> (i32, i32, i32) {
    %c0_i32 = arith.constant 0 : i32
    %c0_i32_0 = arith.constant 0 : i32
    %c0_i32_1 = arith.constant 0 : i32
    return %arg0, %c0_i32, %c0_i32_0 : i32, i32, i32
  }
}

</mosaic_0001>

<bundles_post_ra>
// kernel: attention_block_forward.5
= control target key start
LH: loop header
LB: loop body
LE: loop exit
PB: predicated region body
PF: predicated region fallthrough
CT: control target
= control target key end

     0   :  { %s399_s19 = smov 0   ;;  %s419_s0 = inlined_call_operand.vmem [shape: f32[4,512], index: 0, kind: input, shape index: {}]   ;;  %s420_s1 = inlined_call_operand.vmem [shape: f32[1,512], index: 1, kind: input, shape index: {}]   ;;  %s421_s2 = inlined_call_operand.<no memory space> [shape: f32[1,1], index: 2, kind: input, shape index: {}]   ;;  %s422_s4 = inlined_call_operand.vmem [shape: f32[4,512], index: 4, kind: output, shape index: {}]   ;;  %s423_s3 = inlined_call_operand.<no memory space> [shape: f32[1,1], index: 3, kind: input, shape index: {}]  }
   0x1   :  { %v9_v0 = vstv %s421_s2  ;;  %v11_v1 = vstv %s423_s3 }
   0x2   :  { %10 = vst [vmem:[#allocation2] sm:$0x1] %v9_v0  ;;  %12 = vst [vmem:[#allocation3] sm:$0x1] %v11_v1 }
   0x3 LB: > { %s332_s20 = sadd.s32 4294967295, %s365_s19   ;;  %p336_p0 = scmp.ge.s32.totalorder %s365_s19, 1  ;;  %s365_s19 = sphi %s399_s19, %s18_s19  }
   0x4   : > { %p177_p1 = scmp.lt.s32.totalorder %s365_s19, 3 }
   0x6   : > { %p178_p2 = pnand %p336_p0, %p177_p1 }
   0x7   : > { %v367_v3 = vmov (!%p178_p2), 0   ;;  %s337_s2 = sshll.u32 (!%p178_p2), %s332_s20, 1  ;;  %v231_v5 = vlaneseq (!%p178_p2) }
   0x8   : > { %181 = sbr.rel (%p178_p2) target bundleno = 179 (0xb3), region = 36  ;;  %354 = vset.pattern.permute.xlu0 (!%p178_p2), %v367_v3  ;;  %p208_p3 = scmp.lt.s32.totalorder (!%p178_p2), %s337_s2, 3 }
   0x9   : > { %v225_v2 = vld [vmem:[#allocation2] sm:$0x1] (!%p178_p2)  ;;  %v236_v4 = vld [vmem:[#allocation3] sm:$0x1] (!%p178_p2)  ;;  %v232_v6 = vshrl.u32 (!%p178_p2), %v231_v5, 7 }
   0xa   : > { %228 = vperm.xlu0 (!%p178_p2), %354, %v225_v2  }
   0xb   : > { %v233_v7 = vsub.s32 (!%p178_p2), 0, %v232_v6  ;;  %v261_v18 = vsub.s32 (!%p178_p2), 1, %v232_v6 }
   0xe   : > { %239 = vperm.xlu0 (!%p178_p2), %354, %v236_v4  }
   0xf   : > { %s425_s2 = smov (!%p208_p3, %s337_s2), 3 }
  0x10   : > { %s216_s22 = scalar_lea.vmem %s420_s1, %s425_s2  ;;  %s338_s23 = sshll.u32 %s425_s2, 2 }
  0x11   : > { %v224_v10 = vld [vmem:[%s216_s22] sm:$0x3]  ;;  %s211_s26 = scalar_lea.vmem %s419_s0, %s338_s23  ;;  %s222_s29 = scalar_lea.vmem %s422_s4, %s338_s23 }
  0x12   : > { %v253_v22 = vld [vmem:[%s211_s26] sm:$0xff] }
  0x89   : > { %v229_v8 = vpop.permute.xlu0 %228 }
  0x8a   : > { %v234_v9 = vrot.slane %v229_v8, %v233_v7 }
  0x8c   : > { %v235_v12 = vmul.f32 %v234_v9, %v224_v10 }
  0x8d   : > { %v240_v11 = vpop.permute.xlu0 %239 }
  0x8e   : > { %v245_v13 = vrot.slane %v240_v11, %v233_v7 }
  0x90   : > { %v246_v14 = vadd.f32 %v245_v13, %v235_v12 }
  0x92   : > { %v342_v15 = vmul.f32 -1.442695, %v246_v14 }
  0x94   : > { %355 = vpow2.f32 %v342_v15 }
  0x9e   : > { %v356_v16 = vpop.eup %355 }
  0x9f   : > { %v250_v17 = vadd.f32 1.0, %v356_v16 }
  0xa1   : > { %357 = vrcp.f32 %v250_v17 }
  0xab   : > { %v358_v19 = vpop.eup %357 }
  0xac   : > { %v258_v20 = vrot.slane %v358_v19, %v233_v7  ;;  %v262_v21 = vrot.slane %v358_v19, %v261_v18 }
  0xae   : > { %v263_v23 = vcombine.low %v258_v20, %v262_v21 }
  0xb0   : > { %v265_v24 = vmul.f32 %v263_v23, %v253_v22 }
  0xb2   : > { %266 = vst [vmem:[%s222_s29] sm:$0xff] %v265_v24 }
  0xb3 PF: > { %s18_s19 = sadd.s32 1, %s365_s19  }
  0xb4   : > { %p15_p4 = scmp.ge.s32.totalorder %s18_s19, 4  }
  0xb6   :  { %17 = sbr.rel (!%p15_p4) target bundleno = 3 (0x3), region = 69 }

// kernel: attention_block_forward.3
= control target key start
LH: loop header
LB: loop body
LE: loop exit
PB: predicated region body
PF: predicated region fallthrough
CT: control target
= control target key end

     0   :  { %s1024_s30 = smov 0   ;;  %s1136_s0 = inlined_call_operand.vmem [shape: f32[4,512], index: 0, kind: input, shape index: {}]   ;;  %s1137_s1 = inlined_call_operand.vmem [shape: f32[4,512], index: 1, kind: input, shape index: {}]   ;;  %s1138_s2 = inlined_call_operand.vmem [shape: f32[32,4], index: 2, kind: input, shape index: {}]   ;;  %s1139_s3 = inlined_call_operand.vmem [shape: f32[32,1], index: 3, kind: input, shape index: {}]   ;;  %s1140_s4 = inlined_call_operand.vmem [shape: f32[32,4], index: 4, kind: input, shape index: {}]   ;;  %s1141_s5 = inlined_call_operand.vmem [shape: f32[32,1], index: 5, kind: input, shape index: {}]   ;;  %s1142_s6 = inlined_call_operand.vmem [shape: f32[2,32,1], index: 6, kind: output, shape index: {0}]   ;;  %s1143_s7 = inlined_call_operand.vmem [shape: f32[2,32,1], index: 7, kind: output, shape index: {1}]   ;;  %s1144_s8 = inlined_call_operand.vmem [shape: f32[2,32,1], index: 8, kind: output, shape index: {2}]   ;;  %s1145_s9 = inlined_call_operand.vmem [shape: f32[2,32,1], index: 9, kind: output, shape index: {3}]  }
   0x1 LB: > { %s1030_s10 = sadd.s32 4294967295, %s970_s30   ;;  %p919_p0 = scmp.ge.s32.totalorder %s970_s30, 1  ;;  %s970_s30 = sphi %s1024_s30, %s20_s30  }
   0x2   : > { %p306_p1 = scmp.lt.s32.totalorder %s970_s30, 3 }
   0x4   : > { %p307_p2 = pnand %p919_p0, %p306_p1 }
   0x5   : > { %s920_s11 = sshll.u32 (!%p307_p2), %s1030_s10, 1  ;;  %v972_v0 = vmov (!%p307_p2), 0.0   ;;  %v973_v1 = vmov (!%p307_p2), 0   ;;  %v401_v2 = vld [vmem:[%s1139_s3 + $0x10] sm:$0xff] (!%p307_p2)  ;;  %v399_v3 = vld [vmem:[%s1139_s3] sm:$0xff] (!%p307_p2)  ;;  %v402_v4 = vld [vmem:[%s1139_s3 + $0x18] sm:$0xff] (!%p307_p2) }
   0x6   : > { %310 = sbr.rel (%p307_p2) target bundleno = 414 (0x19e), region = 44  ;;  %p363_p3 = scmp.lt.s32.totalorder (!%p307_p2), %s920_s11, 3  ;;  %507 = vmatprep.mubr.f32.mxu0 (!%p307_p2), %v972_v0  ;;  %643 = vmatprep.mubr.f32.mxu1 (!%p307_p2), %v972_v0  ;;  %v400_v5 = vld [vmem:[%s1139_s3 + $0x8] sm:$0xff] (!%p307_p2)  ;;  %vm438_vm0 = vcmask (!%p307_p2), 1043456   ;;  %v394_v10 = vld [vmem:[%s1138_s2] sm:$0xff] (!%p307_p2)  ;;  %vm425_vm1 = vcmask (!%p307_p2), 31744  }
   0x7   : > { %961 = vset.pattern.permute.xlu1 (!%p307_p2), %v973_v1  ;;  %960 = vset.pattern.permute.xlu0 (!%p307_p2), %v973_v1  ;;  %v532_v11 = vld [vmem:[%s1140_s4] sm:$0xff] (!%p307_p2)  ;;  %v538_v12 = vld [vmem:[%s1141_s5 + $0x8] sm:$0xff] (!%p307_p2)  ;;  %v540_v16 = vld [vmem:[%s1141_s5 + $0x18] sm:$0xff] (!%p307_p2)  ;;  %p374_p4 = scmp.lt.s32.totalorder (!%p307_p2), %s1030_s10, 1  ;;  %vm680_vm2 = vcmask (!%p307_p2), 7168  }
   0x8   : > { %415 = vperm.xlu1 (!%p307_p2), %961, %v401_v2   ;;  %405 = vperm.xlu0 (!%p307_p2), %960, %v399_v3   ;;  %v537_v13 = vld [vmem:[%s1141_s5] sm:$0xff] (!%p307_p2)  ;;  %v395_v14 = vld [vmem:[%s1138_s2 + $0x8] sm:$0xff] (!%p307_p2)  ;;  %v539_v17 = vld [vmem:[%s1141_s5 + $0x10] sm:$0xff] (!%p307_p2) }
   0x9   : > { %v533_v15 = vld [vmem:[%s1140_s4 + $0x8] sm:$0xff] (!%p307_p2)  ;;  %v396_v18 = vld [vmem:[%s1138_s2 + $0x10] sm:$0xff] (!%p307_p2)  ;;  %v397_v20 = vld [vmem:[%s1138_s2 + $0x18] sm:$0xff] (!%p307_p2) }
   0xa   : > { %v534_v19 = vld [vmem:[%s1140_s4 + $0x10] sm:$0xff] (!%p307_p2)  ;;  %v535_v21 = vld [vmem:[%s1140_s4 + $0x18] sm:$0xff] (!%p307_p2) }
   0xc   : > { %420 = vperm.xlu1 (!%p307_p2), %961, %v402_v4   ;;  %410 = vperm.xlu0 (!%p307_p2), %960, %v400_v5  }
   0xd   : > { %s1147_s11 = smov (!%p363_p3, %s920_s11), 3  ;;  %s1149_s10 = smov (!%p374_p4, %s1030_s10), 1 }
   0xe   : > { %s921_s16 = sshll.u32 %s1147_s11, 2  ;;  %s946_s13 = sshll.u32 %s1149_s10, 5 }
   0xf   : > { %s366_s23 = scalar_lea.vmem %s1136_s0, %s921_s16  ;;  %s372_s26 = scalar_lea.vmem %s1137_s1, %s921_s16 }
  0x10   : > { %v398_v6 = vld [vmem:[%s366_s23] sm:$0xff]  ;;  %548 = vperm.xlu1 %961, %v538_v12   ;;  %543 = vperm.xlu0 %960, %v537_v13   ;;  %s1102_s16 = scalar_lea.vmem %s1144_s8, %s946_s13  ;;  %s378_s19 = scalar_lea.vmem %s1142_s6, %s946_s13 }
  0x11   : > { %v536_v7 = vld [vmem:[%s372_s26] sm:$0xff]  ;;  %v424_v8 = vcombine.high %v398_v6, %v398_v6  ;;  %s383_s21 = scalar_lea.vmem %s1143_s7, %s946_s13  ;;  %s393_s24 = scalar_lea.vmem %s1145_s9, %s946_s13 }
  0x12   : > { %v562_v9 = vcombine.high %v536_v7, %v536_v7 }
  0x13   : > { %932 = vmatprep.subr.msk.mxu0 %vm438_vm0, %v424_v8 }
  0x14   : > { %938 = vmatprep.subr.msk.mxu1 %vm438_vm0, %v562_v9  ;;  %933 = vmatpush1.msk.msra.mxu0 %vm438_vm0, %v398_v6 }
  0x15   : > { %939 = vmatpush1.msk.msra.mxu1 %vm438_vm0, %v536_v7  ;;  %934 = vmatmul.mubr.msk.f32.vlgmr.msra.gmra.mrb[0].mxu0 %vm425_vm1, %v394_v10 }
  0x16   : > { %940 = vmatmul.mubr.msk.f32.vlgmr.msra.gmra.mrb[0].mxu1 %vm425_vm1, %v532_v11  ;;  %513 = vmatprep.mubr.f32.mxu0 %v972_v0 }
  0x17   : > { %649 = vmatprep.mubr.f32.mxu1 %v972_v0  ;;  %558 = vperm.xlu1 %961, %v540_v16  }
  0x18   : > { %553 = vperm.xlu0 %960, %v539_v17  }
  0x19   : > { %935 = vmatmul.mubr.msk.f32.gmra.mrb[2].mxu0 %vm425_vm1, %v395_v14 }
  0x1a   : > { %941 = vmatmul.mubr.msk.f32.gmra.mrb[2].mxu1 %vm425_vm1, %v533_v15  ;;  %519 = vmatprep.mubr.f32.mxu0 %v972_v0 }
  0x1b   : > { %655 = vmatprep.mubr.f32.mxu1 %v972_v0 }
  0x1d   : > { %936 = vmatmul.mubr.msk.f32.gmra.mrb[4].mxu0 %vm425_vm1, %v396_v18 }
  0x1e   : > { %942 = vmatmul.mubr.msk.f32.gmra.mrb[4].mxu1 %vm425_vm1, %v534_v19  ;;  %525 = vmatprep.mubr.f32.mxu0 %v972_v0 }
  0x1f   : > { %661 = vmatprep.mubr.f32.mxu1 %v972_v0 }
  0x21   : > { %937 = vmatmul.mubr.msk.f32.gmra.mrb[6].mxu0 %vm425_vm1, %v397_v20 }
  0x22   : > { %943 = vmatmul.mubr.msk.f32.gmra.mrb[6].mxu1 %vm425_vm1, %v535_v21 }
  0x87   : > { %v406_v22 = vpop.permute.xlu0 %405  ;;  %v416_v23 = vpop.permute.xlu1 %415 }
  0x8b   : > { %v411_v24 = vpop.permute.xlu0 %410  ;;  %v421_v25 = vpop.permute.xlu1 %420 }
  0x8f   : > { %v544_v26 = vpop.permute.xlu0 %543  ;;  %v549_v35 = vpop.permute.xlu1 %548 }
  0x96   : > { %v559_v4 = vpop.permute.xlu1 %558 }
  0x97   : > { %v554_v51 = vpop.permute.xlu0 %553 }
  0xe8   : > { %v509_v27 = vpop.f32.mrb[0].mxu0 }
  0xe9   : > { %v645_v28 = vpop.f32.mrb[0].mxu1  ;;  %v510_v29 = vadd.f32 %v509_v27, %v406_v22  ;;  %v511_v31 = vpop.f32.mrb[1].mxu0 }
  0xea   : > { %v646_v30 = vadd.f32 %v645_v28, %v544_v26  ;;  %v647_v32 = vpop.f32.mrb[1].mxu1  ;;  %v512_v33 = vadd.f32 %v511_v31, %v406_v22 }
  0xeb   : > { %v648_v34 = vadd.f32 %v647_v32, %v544_v26  ;;  %v685_v36 = vmul.f32 %v510_v29, %v510_v29 }
  0xec   : > { %v725_v37 = vmul.f32 %v646_v30, %v646_v30  ;;  %v686_v38 = vmul.f32 %v512_v33, %v512_v33  ;;  %v515_v40 = vpop.f32.mrb[2].mxu0  ;;  %v668_v43 = vadd.f32 %v512_v33, %v510_v29 }
  0xed   : > { %v726_v39 = vmul.f32 %v648_v34, %v648_v34  ;;  %v651_v41 = vpop.f32.mrb[2].mxu1  ;;  %v709_v42 = vadd.f32 %v648_v34, %v646_v30  ;;  %v516_v44 = vadd.f32 %v515_v40, %v411_v24  ;;  %v517_v46 = vpop.f32.mrb[3].mxu0 }
  0xee   : > { %v652_v45 = vadd.f32 %v651_v41, %v549_v35  ;;  %v653_v47 = vpop.f32.mrb[3].mxu1  ;;  %v518_v48 = vadd.f32 %v517_v46, %v411_v24  ;;  %669 = vadd.xlane.f32.xlu0 %v668_v43  ;;  %v693_v50 = vadd.f32 %v686_v38, %v685_v36 }
  0xef   : > { %v654_v49 = vadd.f32 %v653_v47, %v549_v35  ;;  %710 = vadd.xlane.f32.xlu1 %v709_v42  ;;  %v687_v52 = vmul.f32 %v516_v44, %v516_v44  ;;  %v733_v54 = vadd.f32 %v726_v39, %v725_v37 }
  0xf0   : > { %v727_v53 = vmul.f32 %v652_v45, %v652_v45  ;;  %v688_v55 = vmul.f32 %v518_v48, %v518_v48  ;;  %v521_v57 = vpop.f32.mrb[4].mxu0  ;;  %v671_v60 = vadd.f32 %v518_v48, %v516_v44 }
  0xf1   : > { %v728_v56 = vmul.f32 %v654_v49, %v654_v49  ;;  %v657_v58 = vpop.f32.mrb[4].mxu1  ;;  %v712_v59 = vadd.f32 %v654_v49, %v652_v45  ;;  %v522_v61 = vadd.f32 %v521_v57, %v416_v23  ;;  %v523_v63 = vpop.f32.mrb[5].mxu0 }
  0xf2   : > { %v658_v62 = vadd.f32 %v657_v58, %v554_v51  ;;  %v659_v0 = vpop.f32.mrb[5].mxu1  ;;  %v524_v1 = vadd.f32 %v523_v63, %v416_v23  ;;  %v696_v3 = vadd.f32 %v688_v55, %v687_v52 }
  0xf3   : > { %v660_v2 = vadd.f32 %v659_v0, %v554_v51  ;;  %694 = vadd.xlane.f32.xlu1 %v693_v50  ;;  %713 = vadd.xlane.f32.xlu0 %v712_v59  ;;  %v689_v5 = vmul.f32 %v522_v61, %v522_v61  ;;  %v736_v7 = vadd.f32 %v728_v56, %v727_v53 }
  0xf4   : > { %v729_v6 = vmul.f32 %v658_v62, %v658_v62  ;;  %v690_v8 = vmul.f32 %v524_v1, %v524_v1  ;;  %v527_v10 = vpop.f32.mrb[6].mxu0  ;;  %v674_v13 = vadd.f32 %v524_v1, %v522_v61 }
  0xf5   : > { %v730_v9 = vmul.f32 %v660_v2, %v660_v2  ;;  %v663_v11 = vpop.f32.mrb[6].mxu1  ;;  %v715_v12 = vadd.f32 %v660_v2, %v658_v62  ;;  %v528_v14 = vadd.f32 %v527_v10, %v421_v25  ;;  %v529_v16 = vpop.f32.mrb[7].mxu0 }
  0xf6   : > { %v664_v15 = vadd.f32 %v663_v11, %v559_v4  ;;  %v665_v17 = vpop.f32.mrb[7].mxu1  ;;  %v530_v18 = vadd.f32 %v529_v16, %v421_v25  ;;  %v699_v20 = vadd.f32 %v690_v8, %v689_v5 }
  0xf7   : > { %v666_v19 = vadd.f32 %v665_v17, %v559_v4  ;;  %734 = vadd.xlane.f32.xlu1 %v733_v54  ;;  %697 = vadd.xlane.f32.xlu0 %v696_v3  ;;  %v691_v21 = vmul.f32 %v528_v14, %v528_v14  ;;  %v739_v23 = vadd.f32 %v730_v9, %v729_v6 }
  0xf8   : > { %v731_v22 = vmul.f32 %v664_v15, %v664_v15  ;;  %v692_v24 = vmul.f32 %v530_v18, %v530_v18  ;;  %v677_v27 = vadd.f32 %v530_v18, %v528_v14 }
  0xf9   : > { %v732_v26 = vmul.f32 %v666_v19, %v666_v19  ;;  %v718_v28 = vadd.f32 %v666_v19, %v664_v15 }
  0xfa   : > { %v702_v29 = vadd.f32 %v692_v24, %v691_v21 }
  0xfb   : > { %672 = vadd.xlane.f32.xlu1 %v671_v60  ;;  %737 = vadd.xlane.f32.xlu0 %v736_v7  ;;  %v742_v30 = vadd.f32 %v732_v26, %v731_v22 }
  0xff   : > { %716 = vadd.xlane.f32.xlu1 %v715_v12  ;;  %675 = vadd.xlane.f32.xlu0 %v674_v13 }
 0x103   : > { %700 = vadd.xlane.f32.xlu1 %v699_v20  ;;  %678 = vadd.xlane.f32.xlu0 %v677_v27 }
 0x107   : > { %740 = vadd.xlane.f32.xlu1 %v739_v23  ;;  %719 = vadd.xlane.f32.xlu0 %v718_v28 }
 0x10b   : > { %703 = vadd.xlane.f32.xlu0 %v702_v29 }
 0x10f   : > { %743 = vadd.xlane.f32.xlu0 %v742_v30 }
 0x17b   : > { %v670_v31 = vpop.xlane.xlu0 %669 }
 0x17c   : > { %v711_v25 = vpop.xlane.xlu1 %710  ;;  %681 = vst.msk [vmem:[%s378_s19] sm:$0xff] %vm680_vm2, %v670_v31 }
 0x17d   : > { %721 = vst.msk [vmem:[%s1102_s16] sm:$0xff] %vm680_vm2, %v711_v25 }
 0x180   : > { %v695_v32 = vpop.xlane.xlu1 %694  ;;  %v714_v33 = vpop.xlane.xlu0 %713 }
 0x181   : > { %705 = vst.msk [vmem:[%s383_s21] sm:$0xff] %vm680_vm2, %v695_v32  ;;  %722 = vst.msk [vmem:[%s1102_s16 + $0x8] sm:$0xff] %vm680_vm2, %v714_v33 }
 0x184   : > { %v735_v34 = vpop.xlane.xlu1 %734  ;;  %v698_v35 = vpop.xlane.xlu0 %697 }
 0x185   : > { %745 = vst.msk [vmem:[%s393_s24] sm:$0xff] %vm680_vm2, %v735_v34  ;;  %706 = vst.msk [vmem:[%s383_s21 + $0x8] sm:$0xff] %vm680_vm2, %v698_v35 }
 0x188   : > { %v673_v36 = vpop.xlane.xlu1 %672  ;;  %v738_v37 = vpop.xlane.xlu0 %737 }
 0x189   : > { %682 = vst.msk [vmem:[%s378_s19 + $0x8] sm:$0xff] %vm680_vm2, %v673_v36  ;;  %746 = vst.msk [vmem:[%s393_s24 + $0x8] sm:$0xff] %vm680_vm2, %v738_v37 }
 0x18c   : > { %v717_v38 = vpop.xlane.xlu1 %716  ;;  %v676_v39 = vpop.xlane.xlu0 %675 }
 0x18d   : > { %723 = vst.msk [vmem:[%s1102_s16 + $0x10] sm:$0xff] %vm680_vm2, %v717_v38  ;;  %683 = vst.msk [vmem:[%s378_s19 + $0x10] sm:$0xff] %vm680_vm2, %v676_v39 }
 0x190   : > { %v701_v40 = vpop.xlane.xlu1 %700  ;;  %v679_v41 = vpop.xlane.xlu0 %678 }
 0x191   : > { %707 = vst.msk [vmem:[%s383_s21 + $0x10] sm:$0xff] %vm680_vm2, %v701_v40  ;;  %684 = vst.msk [vmem:[%s378_s19 + $0x18] sm:$0xff] %vm680_vm2, %v679_v41 }
 0x194   : > { %v741_v42 = vpop.xlane.xlu1 %740  ;;  %v720_v43 = vpop.xlane.xlu0 %719 }
 0x195   : > { %747 = vst.msk [vmem:[%s393_s24 + $0x10] sm:$0xff] %vm680_vm2, %v741_v42  ;;  %724 = vst.msk [vmem:[%s1102_s16 + $0x18] sm:$0xff] %vm680_vm2, %v720_v43 }
 0x198   : > { %v704_v44 = vpop.xlane.xlu0 %703 }
 0x199   : > { %708 = vst.msk [vmem:[%s383_s21 + $0x18] sm:$0xff] %vm680_vm2, %v704_v44 }
 0x19c   : > { %v744_v45 = vpop.xlane.xlu0 %743 }
 0x19d   : > { %748 = vst.msk [vmem:[%s393_s24 + $0x18] sm:$0xff] %vm680_vm2, %v744_v45 }
 0x19e PF: > { %s20_s30 = sadd.s32 1, %s970_s30  }
 0x19f   : > { %p17_p5 = scmp.ge.s32.totalorder %s20_s30, 4  }
 0x1a1   :  { %19 = sbr.rel (!%p17_p5) target bundleno = 1 (0x1), region = 113 }

// kernel: attention_block_forward.4
= control target key start
LH: loop header
LB: loop body
LE: loop exit
PB: predicated region body
PF: predicated region fallthrough
CT: control target
= control target key end

     0   :  { %s998_s11 = smov 0   ;;  %s1080_s0 = inlined_call_operand.vmem [shape: f32[4,512], index: 0, kind: input, shape index: {}]   ;;  %s1081_s1 = inlined_call_operand.vmem [shape: f32[4,512], index: 1, kind: input, shape index: {}]   ;;  %s1082_s2 = inlined_call_operand.vmem [shape: f32[32,4], index: 2, kind: input, shape index: {}]   ;;  %s1083_s3 = inlined_call_operand.vmem [shape: f32[32,4], index: 3, kind: input, shape index: {}]   ;;  %s1084_s4 = inlined_call_operand.vmem [shape: f32[32,1], index: 4, kind: input, shape index: {}]   ;;  %s1085_s5 = inlined_call_operand.vmem [shape: f32[1,32], index: 5, kind: input, shape index: {}]   ;;  %s1086_s6 = inlined_call_operand.<no memory space> [shape: f32[1,1], index: 6, kind: input, shape index: {}]   ;;  %s1087_s7 = inlined_call_operand.vmem [shape: f32[1,512], index: 7, kind: output, shape index: {0}]   ;;  %s1088_s8 = inlined_call_operand.vmem [shape: f32[2,1,1], index: 8, kind: output, shape index: {1}]   ;;  %s1089_s9 = inlined_call_operand.vmem [shape: f32[2,1,1], index: 9, kind: output, shape index: {2}]  }
   0x1   :  { %v15_v0 = vstv %s1086_s6 }
   0x2   :  { %16 = vst [vmem:[#allocation2] sm:$0x1] %v15_v0 }
   0x3 LB: > { %s1004_s12 = sadd.s32 4294967295, %s940_s11   ;;  %p882_p0 = scmp.ge.s32.totalorder %s940_s11, 1  ;;  %s940_s11 = sphi %s998_s11, %s22_s11  }
   0x4   : > { %p306_p1 = scmp.lt.s32.totalorder %s940_s11, 3 }
   0x6   : > { %p307_p2 = pnand %p882_p0, %p306_p1 }
   0x7   : > { %s883_s13 = sshll.u32 (!%p307_p2), %s1004_s12, 1  ;;  %v942_v1 = vmov (!%p307_p2), 0.0   ;;  %v943_v2 = vmov (!%p307_p2), 0   ;;  %v601_v3 = vld [vmem:[%s1084_s4] sm:$0xff] (!%p307_p2)  ;;  %v603_v4 = vld [vmem:[%s1084_s4 + $0x10] sm:$0xff] (!%p307_p2)  ;;  %v602_v5 = vld [vmem:[%s1084_s4 + $0x8] sm:$0xff] (!%p307_p2) }
   0x8   : > { %310 = sbr.rel (%p307_p2) target bundleno = 624 (0x270), region = 48  ;;  %p353_p3 = scmp.lt.s32.totalorder (!%p307_p2), %s883_s13, 3  ;;  %469 = vmatprep.mubr.f32.mxu1 (!%p307_p2), %v942_v1  ;;  %576 = vmatprep.mubr.f32.mxu0 (!%p307_p2), %v942_v1  ;;  %v604_v6 = vld [vmem:[%s1084_s4 + $0x18] sm:$0xff] (!%p307_p2)  ;;  %vm400_vm0 = vcmask (!%p307_p2), 1043456   ;;  %v380_v11 = vld [vmem:[%s1083_s3] sm:$0xff] (!%p307_p2)  ;;  %vm387_vm1 = vcmask (!%p307_p2), 31744  }
   0x9   : > { %930 = vset.pattern.permute.xlu0 (!%p307_p2), %v943_v2  ;;  %931 = vset.pattern.permute.xlu1 (!%p307_p2), %v943_v2  ;;  %v375_v12 = vld [vmem:[%s1082_s2] sm:$0xff] (!%p307_p2)  ;;  %v381_v14 = vld [vmem:[%s1083_s3 + $0x8] sm:$0xff] (!%p307_p2)  ;;  %v382_v16 = vld [vmem:[%s1083_s3 + $0x10] sm:$0xff] (!%p307_p2)  ;;  %vm652_vm2 = vcmask (!%p307_p2), 261120   ;;  %vm750_vm3 = vcmask (!%p307_p2), 1040384   ;;  %p369_p4 = scmp.lt.s32.totalorder (!%p307_p2), %s1004_s12, 1 }
   0xa   : > { %607 = vperm.xlu0 (!%p307_p2), %930, %v601_v3   ;;  %617 = vperm.xlu1 (!%p307_p2), %931, %v603_v4   ;;  %v642_v13 = vld [vmem:[#allocation2] sm:$0x1] (!%p307_p2)  ;;  %v376_v15 = vld [vmem:[%s1082_s2 + $0x8] sm:$0xff] (!%p307_p2)  ;;  %v377_v17 = vld [vmem:[%s1082_s2 + $0x10] sm:$0xff] (!%p307_p2)  ;;  %vm756_vm5 = vcmask (!%p307_p2), 0  }
   0xb   : > { %v383_v18 = vld [vmem:[%s1083_s3 + $0x18] sm:$0xff] (!%p307_p2)  ;;  %v641_v4 = vld [vmem:[%s1085_s5] sm:$0x1] (!%p307_p2) }
   0xc   : > { %v378_v19 = vld [vmem:[%s1082_s2 + $0x18] sm:$0xff] (!%p307_p2) }
   0xe   : > { %612 = vperm.xlu0 (!%p307_p2), %930, %v602_v5   ;;  %622 = vperm.xlu1 (!%p307_p2), %931, %v604_v6   ;;  %v648_v5 = vlaneseq (!%p307_p2) }
   0xf   : > { %s1091_s13 = smov (!%p353_p3, %s883_s13), 3  ;;  %s1093_s12 = smov (!%p369_p4, %s1004_s12), 1 }
  0x10   : > { %s884_s17 = sshll.u32 %s1091_s13, 2  ;;  %v649_v6 = vshrl.u32 %v648_v5, 7  ;;  %s367_s29 = scalar_lea.vmem %s1087_s7, %s1091_s13  ;;  %vm747_vm4 = vcmp.lt.s32.totalorder %v648_v5, 256 }
  0x11   : > { %s362_s22 = scalar_lea.vmem %s1081_s1, %s884_s17  ;;  %s356_s25 = scalar_lea.vmem %s1080_s0, %s884_s17 }
  0x12   : > { %v384_v7 = vld [vmem:[%s362_s22] sm:$0xff]  ;;  %645 = vperm.xlu0 %930, %v642_v13   ;;  %s371_s6 = scalar_lea.vmem %s1088_s8, %s1093_s12  ;;  %s374_s16 = scalar_lea.vmem %s1089_s9, %s1093_s12 }
  0x13   : > { %v379_v8 = vld [vmem:[%s356_s25] sm:$0xff]  ;;  %v386_v9 = vcombine.high %v384_v7, %v384_v7 }
  0x14   : > { %v495_v10 = vcombine.high %v379_v8, %v379_v8 }
  0x15   : > { %888 = vmatprep.subr.msk.mxu1 %vm400_vm0, %v386_v9  ;;  %v650_v9 = vsub.s32 0, %v649_v6 }
  0x16   : > { %894 = vmatprep.subr.msk.mxu0 %vm400_vm0, %v495_v10  ;;  %889 = vmatpush1.msk.msra.mxu1 %vm400_vm0, %v384_v7  ;;  %v944_v7 = vmov 1966171168  }
  0x17   : > { %895 = vmatpush1.msk.msra.mxu0 %vm400_vm0, %v379_v8  ;;  %890 = vmatmul.mubr.msk.f32.vlgmr.msra.gmra.mrb[0].mxu1 %vm387_vm1, %v380_v11  ;;  %v731_v8 = vunpack.c.l.s4 %v944_v7 }
  0x18   : > { %896 = vmatmul.mubr.msk.f32.vlgmr.msra.gmra.mrb[0].mxu0 %vm387_vm1, %v375_v12  ;;  %475 = vmatprep.mubr.f32.mxu1 %v942_v1 }
  0x19   : > { %582 = vmatprep.mubr.f32.mxu0 %v942_v1  ;;  %v732_v11 = vunpack.c.0.s8 %v731_v8 }
  0x1b   : > { %891 = vmatmul.mubr.msk.f32.gmra.mrb[2].mxu1 %vm387_vm1, %v381_v14 }
  0x1c   : > { %897 = vmatmul.mubr.msk.f32.gmra.mrb[2].mxu0 %vm387_vm1, %v376_v15  ;;  %481 = vmatprep.mubr.f32.mxu1 %v942_v1 }
  0x1d   : > { %588 = vmatprep.mubr.f32.mxu0 %v942_v1 }
  0x1f   : > { %892 = vmatmul.mubr.msk.f32.gmra.mrb[4].mxu1 %vm387_vm1, %v382_v16  ;;  %v735_v16 = vsub.s32 %v732_v11, %v649_v6 }
  0x20   : > { %898 = vmatmul.mubr.msk.f32.gmra.mrb[4].mxu0 %vm387_vm1, %v377_v17  ;;  %487 = vmatprep.mubr.f32.mxu1 %v942_v1 }
  0x21   : > { %594 = vmatprep.mubr.f32.mxu0 %v942_v1 }
  0x23   : > { %893 = vmatmul.mubr.msk.f32.gmra.mrb[6].mxu1 %vm387_vm1, %v383_v18 }
  0x24   : > { %899 = vmatmul.mubr.msk.f32.gmra.mrb[6].mxu0 %vm387_vm1, %v378_v19  ;;  %720 = vmatprep.mubr.f32.mxu1 %v942_v1 }
  0x89   : > { %v608_v20 = vpop.permute.xlu0 %607  ;;  %v618_v37 = vpop.permute.xlu1 %617 }
  0x8d   : > { %v613_v33 = vpop.permute.xlu0 %612  ;;  %v623_v58 = vpop.permute.xlu1 %622 }
  0x91   : > { %v646_v10 = vpop.permute.xlu0 %645 }
  0x92   : > { %v651_v12 = vrot.slane %v646_v10, %v650_v9 }
  0xea   : > { %v471_v21 = vpop.f32.mrb[0].mxu1 }
  0xeb   : > { %v578_v22 = vpop.f32.mrb[0].mxu0  ;;  %v473_v24 = vpop.f32.mrb[1].mxu1 }
  0xec   : > { %v579_v23 = vadd.f32 %v578_v22, %v471_v21  ;;  %v580_v25 = vpop.f32.mrb[1].mxu0 }
  0xed   : > { %v581_v26 = vadd.f32 %v580_v25, %v473_v24 }
  0xee   : > { %v477_v27 = vpop.f32.mrb[2].mxu1  ;;  %v625_v29 = vadd.f32 %v608_v20, %v579_v23 }
  0xef   : > { %v584_v28 = vpop.f32.mrb[2].mxu0  ;;  %v479_v31 = vpop.f32.mrb[3].mxu1  ;;  %v626_v34 = vadd.f32 %v608_v20, %v581_v26 }
  0xf0   : > { %v585_v30 = vadd.f32 %v584_v28, %v477_v27  ;;  %v586_v32 = vpop.f32.mrb[3].mxu0  ;;  %v633_v41 = vmax.f32 %v625_v29, 0.0 }
  0xf1   : > { %v587_v35 = vadd.f32 %v586_v32, %v479_v31  ;;  %v634_v46 = vmax.f32 %v626_v34, 0.0 }
  0xf2   : > { %v627_v36 = vadd.f32 %v613_v33, %v585_v30  ;;  %v483_v39 = vpop.f32.mrb[4].mxu1 }
  0xf3   : > { %v628_v38 = vadd.f32 %v613_v33, %v587_v35  ;;  %v590_v40 = vpop.f32.mrb[4].mxu0  ;;  %v485_v44 = vpop.f32.mrb[5].mxu1 }
  0xf4   : > { %v635_v42 = vmax.f32 %v627_v36, 0.0  ;;  %v591_v43 = vadd.f32 %v590_v40, %v483_v39  ;;  %v592_v45 = vpop.f32.mrb[5].mxu0 }
  0xf5   : > { %v636_v47 = vmax.f32 %v628_v38, 0.0  ;;  %v593_v48 = vadd.f32 %v592_v45, %v485_v44 }
  0xf6   : > { %v905_v49 = vpack.c.bf16 %v635_v42, %v633_v41  ;;  %v489_v50 = vpop.f32.mrb[6].mxu1  ;;  %v629_v53 = vadd.f32 %v618_v37, %v591_v43 }
  0xf7   : > { %v596_v51 = vpop.f32.mrb[6].mxu0  ;;  %v903_v52 = vpack.c.bf16 %v636_v47, %v634_v46  ;;  %v491_v55 = vpop.f32.mrb[7].mxu1  ;;  %v630_v57 = vadd.f32 %v618_v37, %v593_v48 }
  0xf8   : > { %v597_v54 = vadd.f32 %v596_v51, %v489_v50  ;;  %v598_v56 = vpop.f32.mrb[7].mxu0  ;;  %v637_v62 = vmax.f32 %v629_v53, 0.0 }
  0xf9   : > { %v599_v59 = vadd.f32 %v598_v56, %v491_v55  ;;  %904 = vmatprep.subr.bf16.mxu1 %v903_v52  ;;  %v638_v0 = vmax.f32 %v630_v57, 0.0 }
  0xfa   : > { %v631_v60 = vadd.f32 %v623_v58, %v597_v54  ;;  %906 = vmatpush1.bf16.msra.mxu1 %v905_v49 }
  0xfb   : > { %v632_v61 = vadd.f32 %v623_v58, %v599_v59 }
  0xfc   : > { %v639_v63 = vmax.f32 %v631_v60, 0.0 }
  0xfd   : > { %v640_v1 = vmax.f32 %v632_v61, 0.0 }
  0xfe   : > { %v909_v2 = vpack.c.bf16 %v639_v63, %v637_v62 }
  0xff   : > { %v907_v3 = vpack.c.bf16 %v640_v1, %v638_v0 }
 0x101   : > { %908 = vmatprep.subr.bf16.mxu1 %v907_v3 }
 0x102   : > { %910 = vmatpush1.bf16.msra.mxu1 %v909_v2 }
 0x105   : > { %900 = vmatmul.mubr.msk.f32.vlgmr.msra.gmra.mrb[8].mxu1 %vm652_vm2, %v641_v4 }
 0x1d8   : > { %v722_v13 = vpop.f32.mrb[8].mxu1 }
 0x1d9   : > { %v723_v14 = vadd.f32 %v722_v13, %v651_v12  ;;  %v724_v15 = vpop.f32.mrb[9].mxu1 }
 0x1da   : > { %v725_v17 = vadd.f32 %v724_v15, %v651_v12 }
 0x1db   : > { %v751_v18 = vsel %vm750_vm3, %v723_v14, 0.0  ;;  %v758_v19 = vmul.f32 %v723_v14, %v723_v14 }
 0x1dc   : > { %v729_v20 = vcombine.low %v723_v14, %v725_v17  ;;  %v752_v21 = vsel %vm750_vm3, %v725_v17, 0.0  ;;  %v759_v22 = vmul.f32 %v725_v17, %v725_v17 }
 0x1dd   : > { %v753_v23 = vadd.f32 %v752_v21, %v751_v18  ;;  %v760_v24 = vsel %vm750_vm3, %v758_v19, 0.0 }
 0x1de   : > { %v736_v25 = vrot.slane %v729_v20, %v735_v16  ;;  %v761_v26 = vsel %vm750_vm3, %v759_v22, 0.0 }
 0x1df   : > { %754 = vadd.xlane.f32.xlu1 %v753_v23  ;;  %v762_v27 = vadd.f32 %v761_v26, %v760_v24 }
 0x1e0   : > { %v743_v28 = vrot.slane %v736_v25, %v735_v16 }
 0x1e1   : > { %763 = vadd.xlane.f32.xlu0 %v762_v27 }
 0x1e2   : > { %749 = vst.msk [vmem:[%s367_s29] sm:$0x3] %vm747_vm4, %v743_v28 }
 0x26c   : > { %v755_v29 = vpop.xlane.xlu1 %754 }
 0x26d   : > { %757 = vst.msk [vmem:[%s371_s6] sm:$0x1] %vm756_vm5, %v755_v29 }
 0x26e   : > { %v764_v30 = vpop.xlane.xlu0 %763 }
 0x26f   : > { %765 = vst.msk [vmem:[%s374_s16] sm:$0x1] %vm756_vm5, %v764_v30 }
 0x270 PF: > { %s22_s11 = sadd.s32 1, %s940_s11  }
 0x271   : > { %p19_p5 = scmp.ge.s32.totalorder %s22_s11, 4  }
 0x273   :  { %21 = sbr.rel (!%p19_p5) target bundleno = 3 (0x3), region = 105 }

</bundles_post_ra>
